<compile_context>
chip_gen: v7x
topology: tpu7x:2x2x1
jax: 0.10.0
libtpu: 0.0.40
codegen_flags: <defaults>
</compile_context>

<pallas_src>
import jax
import jax.numpy as jnp
from jax import lax
from jax.experimental import pallas as pl
from jax.experimental.pallas import tpu as pltpu

# ---- model hyperparameters (match PDFModel.__init__) ----
INPUT_DIM = 16
HIDDEN = 32
T = 1.0

_SELU_ALPHA = 1.6732632423543772
_SELU_SCALE = 1.0507009873554805


def _round_up(n, m):
    return ((n + m - 1) // m) * m


def _pdf_kernel(x_ref, w1t_ref, b1_ref, w2s_ref, b2s_ref, o_ref):
    # x_ref:   [TB, D]   (batch on sublanes as stored in HBM; no wrapper transpose)
    # w1t_ref: [H, D]    (= W1^T)
    # b1_ref:  [H, 1]
    # w2s_ref: [1, H]    (= (w2 / T) as a row)
    # b2s_ref: [1, 1]    (= b2 / T)
    # o_ref:   [1, TB]   (lane-dense output)
    #
    # First layer on the MXU, contracting the (small, D=16) feature axis of
    # both operands -> h is [H, TB] with batch on the lane axis, so all
    # elementwise work below is lane-dense.
    h = lax.dot_general(
        w1t_ref[...], x_ref[...],
        dimension_numbers=(((1,), (1,)), ((), ())),
        preferred_element_type=jnp.float32)               # [H, TB]
    h = h + b1_ref[...]                                   # broadcast over lanes
    # SELU. exp argument clamped to <= 0: identical result (the positive branch
    # discards it) and keeps padded/garbage lanes of the ragged tail finite.
    e = jnp.exp(jnp.minimum(h, 0.0))
    h = _SELU_SCALE * jnp.where(h > 0.0, h, _SELU_ALPHA * (e - 1.0))
    # Second layer on the (otherwise idle) MXU: [1,H] @ [H,TB] -> [1,TB].
    y = jnp.dot(w2s_ref[...], h, preferred_element_type=jnp.float32) + b2s_ref[...]
    o_ref[...] = jnp.exp(y)


def pdf_model_forward(x, w1, b1, w2, b2, *, temperature=T, max_tb=32768):
    """x: [B, input_dim] f32 -> [B, 1] f32 == exp(log_pdf(x)/T)."""
    B, D = x.shape
    H = w1.shape[-1]

    # Batch tile: multiple of 128 lanes; large tiles amortize the ~0.35us
    # per-step overhead.  For large batches keep >= ~4 grid steps so the
    # "parallel" axis shards across both TensorCores on v7x and each TC still
    # has enough steps to double-buffer.
    TB = min(max_tb, _round_up(B, 128))
    if B >= 4 * 128:
        TB = min(TB, _round_up(-(-B // 4), 128))
    num_tiles = pl.cdiv(B, TB)
    B_pad = num_tiles * TB        # output-only padding (fresh alloc, no HBM cost)

    # Tiny weight reshapes (trace-time; negligible).
    w1t = w1.T.astype(jnp.float32)                               # [H, D]
    b1c = b1.reshape(H, 1).astype(jnp.float32)                   # [H, 1]
    w2s = (w2 / temperature).reshape(1, H).astype(jnp.float32)   # fold 1/T, row
    b2s = (b2 / temperature).reshape(1, 1).astype(jnp.float32)

    out = pl.pallas_call(
        _pdf_kernel,
        out_shape=jax.ShapeDtypeStruct((1, B_pad), jnp.float32),
        grid=(num_tiles,),
        in_specs=[
            pl.BlockSpec((TB, D), lambda i: (i, 0)),      # x tile (ragged tail OK)
            pl.BlockSpec((H, D), lambda i: (0, 0)),       # W1^T    (VMEM-resident)
            pl.BlockSpec((H, 1), lambda i: (0, 0)),       # b1
            pl.BlockSpec((1, H), lambda i: (0, 0)),       # w2 / T  (row)
            pl.BlockSpec((1, 1), lambda i: (0, 0)),       # b2 / T
        ],
        out_specs=pl.BlockSpec((1, TB), lambda i: (0, i)),  # lane-dense output
        compiler_params=pltpu.CompilerParams(
            dimension_semantics=("parallel",),
            # ~2MiB x tile (x2 buffers) + ~8-12MiB [H,TB] temporaries fits
            # comfortably; 48MiB clears v5e's 16MiB scoped default and stays
            # under v7x's 64MiB physical VMEM.
            vmem_limit_bytes=48 * 1024 * 1024),
    )(x.astype(jnp.float32), w1t, b1c, w2s, b2s)

    return out[0, :B].reshape(B, 1)


def init_params(key, input_dim, hidden):
    """Deterministic init mimicking torch.nn.Linear default U[-1/sqrt(fan_in), +]."""
    k1, k2, k3, k4 = jax.random.split(key, 4)
    lim1 = 1.0 / jnp.sqrt(input_dim)
    lim2 = 1.0 / jnp.sqrt(hidden)
    w1 = jax.random.uniform(k1, (input_dim, hidden), jnp.float32, -lim1, lim1)
    b1 = jax.random.uniform(k2, (hidden,), jnp.float32, -lim1, lim1)
    w2 = jax.random.uniform(k3, (hidden, 1), jnp.float32, -lim2, lim2)
    b2 = jax.random.uniform(k4, (1,), jnp.float32, -lim2, lim2)
    return w1, b1, w2, b2


def _reference(x, w1, b1, w2, b2):
    h = x @ w1 + b1
    h = _SELU_SCALE * jnp.where(h > 0.0, h, _SELU_ALPHA * (jnp.exp(h) - 1.0))
    return jnp.exp((h @ w2 + b2) / T)


if __name__ == "__main__":
    key = jax.random.PRNGKey(0)
    kx, kp, kx2 = jax.random.split(key, 3)
    w1, b1, w2, b2 = init_params(kp, INPUT_DIM, HIDDEN)

    # Small test (single padded/ragged tile).
    B = 8
    x = jax.random.normal(kx, (B, INPUT_DIM), jnp.float32)
    out = pdf_model_forward(x, w1, b1, w2, b2)
    jax.block_until_ready(out)
    ref = _reference(x, w1, b1, w2, b2)
    assert out.shape == (B, 1)
    assert jnp.allclose(out, ref, rtol=1e-5, atol=1e-5)

    # Multi-tile test exercising the batch grid + ragged last-tile path.
    B2 = 300
    x2 = jax.random.normal(kx2, (B2, INPUT_DIM), jnp.float32)
    out2 = pdf_model_forward(x2, w1, b1, w2, b2, max_tb=128)  # 3 grid steps
    jax.block_until_ready(out2)
    ref2 = _reference(x2, w1, b1, w2, b2)
    assert out2.shape == (B2, 1)
    assert jnp.allclose(out2, ref2, rtol=1e-5, atol=1e-5)

    print("KERNEL_OK")
</pallas_src>

<mosaic_0001>
module attributes {stable_mosaic.version = 11 : i64} {
  func.func @_pdf_kernel(%arg0: i32, %arg1: memref<128x16xf32, #tpu.memory_space<vmem>>, %arg2: memref<32x16xf32, #tpu.memory_space<vmem>>, %arg3: memref<32x1xf32, #tpu.memory_space<vmem>>, %arg4: memref<1x32xf32, #tpu.memory_space<vmem>>, %arg5: memref<1x1xf32, #tpu.memory_space<vmem>>, %arg6: memref<1x128xf32, #tpu.memory_space<vmem>>) attributes {dimension_semantics = [#tpu.dimension_semantics<parallel>], iteration_bounds = array<i64: 1>, scalar_prefetch = 0 : i64, scratch_operands = 0 : i64, tpu.core_type = #tpu.core_type<tc>, window_params = [{transform_indices = @transform_0, window_bounds = array<i64: 128, 16>}, {pipeline_mode = #tpu.pipeline_mode<synchronous>, transform_indices = @transform_1, window_bounds = array<i64: 32, 16>}, {pipeline_mode = #tpu.pipeline_mode<synchronous>, transform_indices = @transform_2, window_bounds = array<i64: 32, 1>}, {pipeline_mode = #tpu.pipeline_mode<synchronous>, transform_indices = @transform_3, window_bounds = array<i64: 1, 32>}, {pipeline_mode = #tpu.pipeline_mode<synchronous>, transform_indices = @transform_4, window_bounds = array<i64: 1, 1>}, {transform_indices = @transform_5, window_bounds = array<i64: 1, 128>}]} {
    %c0 = arith.constant 0 : index
    %c0_0 = arith.constant 0 : index
    %0 = vector.load %arg2[%c0, %c0_0] : memref<32x16xf32, #tpu.memory_space<vmem>>, vector<32x16xf32>
    %c0_1 = arith.constant 0 : index
    %c0_2 = arith.constant 0 : index
    %1 = vector.load %arg1[%c0_1, %c0_2] : memref<128x16xf32, #tpu.memory_space<vmem>>, vector<128x16xf32>
    %cst = arith.constant dense<0.000000e+00> : vector<32x128xf32>
    %2 = tpu.matmul %0, %1, %cst {dimension_numbers = #tpu.dot_dimension_numbers<[1], [1], [0], [0], [0, 0, 1, 0], [], []>} : vector<32x16xf32>, vector<128x16xf32>, vector<32x128xf32> -> vector<32x128xf32>
    %c0_3 = arith.constant 0 : index
    %c0_4 = arith.constant 0 : index
    %3 = vector.load %arg3[%c0_3, %c0_4] : memref<32x1xf32, #tpu.memory_space<vmem>>, vector<32x1xf32>
    %4 = vector.broadcast %3 : vector<32x1xf32> to vector<32x128xf32>
    %5 = arith.addf %2, %4 : vector<32x128xf32>
    %cst_5 = arith.constant 0.000000e+00 : f32
    %6 = vector.broadcast %cst_5 : f32 to vector<32x128xf32>
    %7 = arith.minimumf %5, %6 : vector<32x128xf32>
    %8 = math.exp %7 : vector<32x128xf32>
    %cst_6 = arith.constant 0.000000e+00 : f32
    %9 = vector.broadcast %cst_6 : f32 to vector<32x128xf32>
    %10 = arith.cmpf ogt, %5, %9 : vector<32x128xf32>
    %cst_7 = arith.constant 1.000000e+00 : f32
    %11 = vector.broadcast %cst_7 : f32 to vector<32x128xf32>
    %12 = arith.subf %8, %11 : vector<32x128xf32>
    %cst_8 = arith.constant 1.67326319 : f32
    %13 = vector.broadcast %cst_8 : f32 to vector<32x128xf32>
    %14 = arith.mulf %13, %12 : vector<32x128xf32>
    %15 = arith.select %10, %5, %14 : vector<32x128xi1>, vector<32x128xf32>
    %cst_9 = arith.constant 1.05070102 : f32
    %16 = vector.broadcast %cst_9 : f32 to vector<32x128xf32>
    %17 = arith.mulf %16, %15 : vector<32x128xf32>
    %c0_10 = arith.constant 0 : index
    %c0_11 = arith.constant 0 : index
    %18 = vector.load %arg4[%c0_10, %c0_11] : memref<1x32xf32, #tpu.memory_space<vmem>>, vector<1x32xf32>
    %cst_12 = arith.constant dense<0.000000e+00> : vector<1x128xf32>
    %19 = tpu.matmul %18, %17, %cst_12 {dimension_numbers = #tpu.dot_dimension_numbers<[1], [0], [0], [1], [0, 0, 1, 1], [], []>} : vector<1x32xf32>, vector<32x128xf32>, vector<1x128xf32> -> vector<1x128xf32>
    %c0_13 = arith.constant 0 : index
    %c0_14 = arith.constant 0 : index
    %20 = vector.load %arg5[%c0_13, %c0_14] : memref<1x1xf32, #tpu.memory_space<vmem>>, vector<1x1xf32>
    %21 = vector.broadcast %20 : vector<1x1xf32> to vector<1x128xf32>
    %22 = arith.addf %19, %21 : vector<1x128xf32>
    %23 = math.exp %22 : vector<1x128xf32>
    %c0_15 = arith.constant 0 : index
    %c0_16 = arith.constant 0 : index
    %24 = vector.load %arg6[%c0_15, %c0_16] : memref<1x128xf32, #tpu.memory_space<vmem>>, vector<1x128xf32>
    tpu.vector_store %arg6[%c0_15, %c0_16], %23 {strides = array<i32>} : memref<1x128xf32, #tpu.memory_space<vmem>>, vector<1x128xf32>,
    return
  }
  func.func @transform_0(%arg0: i32) -> (i32, i32) {
    %c0_i32 = arith.constant 0 : i32
    %c0_i32_0 = arith.constant 0 : i32
    return %arg0, %c0_i32 : i32, i32
  }
  func.func @transform_1(%arg0: i32) -> (i32, i32) {
    %c0_i32 = arith.constant 0 : i32
    %c0_i32_0 = arith.constant 0 : i32
    %c0_i32_1 = arith.constant 0 : i32
    return %c0_i32, %c0_i32_0 : i32, i32
  }
  func.func @transform_2(%arg0: i32) -> (i32, i32) {
    %c0_i32 = arith.constant 0 : i32
    %c0_i32_0 = arith.constant 0 : i32
    %c0_i32_1 = arith.constant 0 : i32
    return %c0_i32, %c0_i32_0 : i32, i32
  }
  func.func @transform_3(%arg0: i32) -> (i32, i32) {
    %c0_i32 = arith.constant 0 : i32
    %c0_i32_0 = arith.constant 0 : i32
    %c0_i32_1 = arith.constant 0 : i32
    return %c0_i32, %c0_i32_0 : i32, i32
  }
  func.func @transform_4(%arg0: i32) -> (i32, i32) {
    %c0_i32 = arith.constant 0 : i32
    %c0_i32_0 = arith.constant 0 : i32
    %c0_i32_1 = arith.constant 0 : i32
    return %c0_i32, %c0_i32_0 : i32, i32
  }
  func.func @transform_5(%arg0: i32) -> (i32, i32) {
    %c0_i32 = arith.constant 0 : i32
    %c0_i32_0 = arith.constant 0 : i32
    return %c0_i32, %arg0 : i32, i32
  }
}

</mosaic_0001>

<bundles_post_ra>
// kernel: tpu_custom_call.1
= control target key start
LH: loop header
LB: loop body
LE: loop exit
PB: predicated region body
PF: predicated region fallthrough
CT: control target
= control target key end

     0   :  { %s708_s0 = inlined_call_operand.vmem [shape: f32[8,16], index: 0, kind: input, shape index: {}]   ;;  %s709_s1 = inlined_call_operand.vmem [shape: f32[32,16], index: 1, kind: input, shape index: {}]   ;;  %s710_s2 = inlined_call_operand.vmem [shape: f32[32,1], index: 2, kind: input, shape index: {}]   ;;  %s711_s3 = inlined_call_operand.vmem [shape: f32[1,32], index: 3, kind: input, shape index: {}]   ;;  %s712_s4 = inlined_call_operand.<no memory space> [shape: f32[1,1], index: 4, kind: input, shape index: {}]   ;;  %s713_s5 = inlined_call_operand.hbm [shape: f32[1,128], index: 5, kind: output, shape index: {}]  }
   0x1   :  { %v10_v0 = vstv %s712_s4 }
   0x2   :  { %11 = vst [vmem:[#allocation2] sm:$0x1] %v10_v0 }
   0x3   :  { %v27_v1 = vld [vmem:[%s708_s0] sm:$0xff]  ;;  %v28_v2 = vld [vmem:[%s708_s0 + $0x8] sm:$0xff]  ;;  %vm67_vm0 = vcmask 130048   ;;  %v29_v3 = vld [vmem:[%s708_s0 + $0x10] sm:$0xff]  ;;  %v541_v7 = vmov 0  }
   0x4   :  { %v446_v4 = vpack.c.bf16 %v28_v2, %v27_v1  ;;  %vm590_vm1 = vmpackc.low %vm67_vm0, %vm67_vm0  ;;  %v30_v6 = vld [vmem:[%s708_s0 + $0x18] sm:$0xff]  ;;  %505 = vset.pattern.permute.xlu0 %v541_v7  ;;  %506 = vset.pattern.permute.xlu1 %v541_v7  ;;  %v23_v9 = vld [vmem:[%s709_s1] sm:$0xff] }
   0x5   :  { %v452_v8 = vpack.c.bf16 %v30_v6, %v29_v3  ;;  %v31_v10 = vld [vmem:[%s708_s0 + $0x20] sm:$0xff]  ;;  %v32_v11 = vld [vmem:[%s708_s0 + $0x28] sm:$0xff]  ;;  %429 = vmatprep.mubr.msk.f32.mxu0 %vm67_vm0, %v23_v9  ;;  %v45_v13 = vld [vmem:[%s710_s2 + $0x10] sm:$0xff] }
   0x6   :  { %448 = vmatprep.subr.msk.bf16.mxu0 %vm590_vm1, %v446_v4  ;;  %v43_v12 = vld [vmem:[%s710_s2] sm:$0xff]  ;;  %59 = vperm.xlu1 %506, %v45_v13  }
   0x7   :  { %451 = vmatpush3.bf16.xpose.msk.msra.mxu0 %vm590_vm1, %v446_v4  ;;  %49 = vperm.xlu0 %505, %v43_v12  }
   0x8   :  { %454 = vmatprep.subr.msk.bf16.mxu0 %vm590_vm1, %v452_v8 }
   0x9   :  { %12 = vsyncpa [#allocation4], 0  ;;  %v458_v14 = vpack.c.bf16 %v32_v11, %v31_v10  ;;  %v44_v15 = vld [vmem:[%s710_s2 + $0x8] sm:$0xff]  ;;  %v46_v16 = vld [vmem:[%s710_s2 + $0x18] sm:$0xff]  ;;  %v542_v36 = vmov 0.0|0.0   ;;  %vm543_vm2 = vmmov 0  }
   0xa   :  { %v246_v17 = vld [vmem:[#allocation2] sm:$0x1]  ;;  %64 = vperm.xlu1 %506, %v46_v16   ;;  %v33_v18 = vld [vmem:[%s708_s0 + $0x30] sm:$0xff]  ;;  %v34_v19 = vld [vmem:[%s708_s0 + $0x38] sm:$0xff]  ;;  %494 = vmatprep.subr.bf16.mxu1 %v542_v36  ;;  %v544_v37 = vmov 0.0   ;;  %vm256_vm7 = vcmask 261120  }
   0xb   :  { %54 = vperm.xlu0 %505, %v44_v15   ;;  %v464_v20 = vpack.c.bf16 %v34_v19, %v33_v18  ;;  %v35_v21 = vld [vmem:[%s708_s0 + $0x40] sm:$0xff]  ;;  %v36_v22 = vld [vmem:[%s708_s0 + $0x48] sm:$0xff]  ;;  %v37_v24 = vld [vmem:[%s708_s0 + $0x50] sm:$0xff]  ;;  %443 = vmatprep.mubr.msk.f32.mxu1 %vm543_vm2, %v544_v37  ;;  %s545_s15 = smov [#allocation3]  }
   0xc   :  { %v470_v23 = vpack.c.bf16 %v36_v22, %v35_v21  ;;  %v38_v25 = vld [vmem:[%s708_s0 + $0x58] sm:$0xff]  ;;  %v39_v27 = vld [vmem:[%s708_s0 + $0x60] sm:$0xff]  ;;  %v40_v28 = vld [vmem:[%s708_s0 + $0x68] sm:$0xff]  ;;  %s339_s16 = sshll.u32 %s545_s15, 4  ;;  %s340_s16 = int_to_ptr.vmem [resolvable:$true] %s339_s16 }
   0xd   :  { %v476_v26 = vpack.c.bf16 %v38_v25, %v37_v24  ;;  %v482_v29 = vpack.c.bf16 %v40_v28, %v39_v27  ;;  %v41_v30 = vld [vmem:[%s708_s0 + $0x70] sm:$0xff]  ;;  %v42_v31 = vld [vmem:[%s708_s0 + $0x78] sm:$0xff]  ;;  %v24_v33 = vld [vmem:[%s709_s1 + $0x8] sm:$0xff]  ;;  %s517_s17 = scalar_lea.vmem %s340_s16, 16  ;;  %p522_p1 = scmp.lt.s32.totalorder %s340_s16, %s340_s16 }
   0xe   :  { %v488_v32 = vpack.c.bf16 %v42_v31, %v41_v30  ;;  %v25_v34 = vld [vmem:[%s709_s1 + $0x10] sm:$0xff]  ;;  %v26_v35 = vld [vmem:[%s709_s1 + $0x18] sm:$0xff]  ;;  %v245_v16 = vld [vmem:[%s711_s3] sm:$0x1]  ;;  %p518_p0 = scmp.ne.s32.totalorder %s340_s16, %s517_s17  ;;  %s521_s3 = scalar_lea.vmem %s340_s16, 32 }
   0xf   :  { %457 = vmatpush3.bf16.xpose.msk.msra.mxu0 %vm590_vm1, %v452_v8  ;;  %249 = vperm.xlu0 %505, %v246_v17   ;;  %v252_v17 = vlaneseq  ;;  %p523_p2 = scmp.lt.s32.totalorder %s521_s3, %s517_s17 }
  0x10   :  { %460 = vmatprep.subr.msk.bf16.mxu0 %vm590_vm1, %v458_v14 }
  0x11   :  { %v253_v18 = vshrl.u32 %v252_v17, 7  ;;  %p524_p3 = por %p523_p2, %p522_p1 }
  0x13   :  { %v254_v19 = vsub.s32 0, %v253_v18  ;;  %p525_p4 = pnand %p524_p3, %p518_p0 }
  0x17   :  { %463 = vmatpush3.bf16.xpose.msk.msra.mxu0 %vm590_vm1, %v458_v14 }
  0x18   :  { %466 = vmatprep.subr.msk.bf16.mxu0 %vm590_vm1, %v464_v20 }
  0x1f   :  { %469 = vmatpush3.bf16.xpose.msk.msra.mxu0 %vm590_vm1, %v464_v20 }
  0x20   :  { %472 = vmatprep.subr.msk.bf16.mxu0 %vm590_vm1, %v470_v23 }
  0x27   :  { %475 = vmatpush3.bf16.xpose.msk.msra.mxu0 %vm590_vm1, %v470_v23 }
  0x28   :  { %478 = vmatprep.subr.msk.bf16.mxu0 %vm590_vm1, %v476_v26 }
  0x2f   :  { %481 = vmatpush3.bf16.xpose.msk.msra.mxu0 %vm590_vm1, %v476_v26 }
  0x30   :  { %484 = vmatprep.subr.msk.bf16.mxu0 %vm590_vm1, %v482_v29 }
  0x37   :  { %487 = vmatpush3.bf16.xpose.msk.msra.mxu0 %vm590_vm1, %v482_v29 }
  0x38   :  { %490 = vmatprep.subr.msk.bf16.mxu0 %vm590_vm1, %v488_v32 }
  0x3f   :  { %493 = vmatpush3.bf16.xpose.msk.msra.mxu0 %vm590_vm1, %v488_v32 }
  0x46   :  { %430 = vmatmul.mubr.msk.f32.vlgmr.msra.gmra.mrb[0].mxu0 %vm67_vm0, %v24_v33 }
  0x47   :  { %432 = vmatprep.mubr.msk.f32.mxu0 %vm67_vm0, %v25_v34 }
  0x4a   :  { %433 = vmatmul.mubr.msk.f32.gmra.mrb[2].mxu0 %vm67_vm0, %v26_v35 }
  0x85   :  { %v60_v39 = vpop.permute.xlu1 %59 }
  0x86   :  { %v50_v38 = vpop.permute.xlu0 %49 }
  0x89   :  { %v65_v46 = vpop.permute.xlu1 %64 }
  0x8a   :  { %v55_v40 = vpop.permute.xlu0 %54 }
  0x8e   :  { %v250_v20 = vpop.permute.xlu0 %249 }
  0x8f   :  { %v255_v21 = vrot.slane %v250_v20, %v254_v19 }
 0x119   :  { %v431_v41 = vpop.f32.mrb[0].mxu0 }
 0x11a   :  { %v200_v42 = vadd.f32 %v431_v41, %v55_v40  ;;  %v194_v43 = vpop.f32.mrb[1].mxu0 }
 0x11b   :  { %v195_v44 = vadd.f32 %v194_v43, %v50_v38 }
 0x11c   :  { %v214_v45 = vmin.f32 %v200_v42, 0.0  ;;  %vm226_vm3 = vcmp.gt.f32.partialorder %v200_v42, 0.0 }
 0x11d   :  { %v213_v47 = vmin.f32 %v195_v44, 0.0  ;;  %v434_v48 = vpop.f32.mrb[2].mxu0  ;;  %vm225_vm4 = vcmp.gt.f32.partialorder %v195_v44, 0.0 }
 0x11e   :  { %v219_v49 = vmul.f32 1.442695, %v214_v45  ;;  %v210_v50 = vadd.f32 %v434_v48, %v65_v46  ;;  %v204_v51 = vpop.f32.mrb[3].mxu0 }
 0x11f   :  { %v217_v52 = vmul.f32 1.442695, %v213_v47  ;;  %v205_v53 = vadd.f32 %v204_v51, %v60_v39 }
 0x120   :  { %507 = vpow2.f32 %v219_v49  ;;  %v216_v54 = vmin.f32 %v210_v50, 0.0  ;;  %vm228_vm5 = vcmp.gt.f32.partialorder %v210_v50, 0.0 }
 0x121   :  { %509 = vpow2.f32 %v217_v52  ;;  %v215_v55 = vmin.f32 %v205_v53, 0.0  ;;  %vm227_vm6 = vcmp.gt.f32.partialorder %v205_v53, 0.0 }
 0x122   :  { %v223_v56 = vmul.f32 1.442695, %v216_v54 }
 0x123   :  { %v221_v57 = vmul.f32 1.442695, %v215_v55 }
 0x124   :  { %511 = vpow2.f32 %v223_v56 }
 0x125   :  { %513 = vpow2.f32 %v221_v57 }
 0x12a   :  { %v508_v58 = vpop.eup %507 }
 0x12b   :  { %v510_v59 = vpop.eup %509  ;;  %v368_v60 = vadd.f32 -1.0, %v508_v58 }
 0x12c   :  { %v367_v61 = vadd.f32 -1.0, %v510_v59 }
 0x12d   :  { %v234_v62 = vmul.f32 1.6732632, %v368_v60 }
 0x12e   :  { %v512_v63 = vpop.eup %511  ;;  %v233_v0 = vmul.f32 1.6732632, %v367_v61 }
 0x12f   :  { %v514_v1 = vpop.eup %513  ;;  %v370_v2 = vadd.f32 -1.0, %v512_v63  ;;  %v238_v3 = vsel %vm226_vm3, %v200_v42, %v234_v62 }
 0x130   :  { %v369_v4 = vadd.f32 -1.0, %v514_v1  ;;  %v237_v5 = vsel %vm225_vm4, %v195_v44, %v233_v0  ;;  %v242_v6 = vmul.f32 1.050701, %v238_v3 }
 0x131   :  { %v236_v7 = vmul.f32 1.6732632, %v370_v2  ;;  %v241_v8 = vmul.f32 1.050701, %v237_v5 }
 0x132   :  { %v235_v9 = vmul.f32 1.6732632, %v369_v4 }
 0x133   :  { %v240_v10 = vsel %vm228_vm5, %v210_v50, %v236_v7  ;;  %v495_v11 = vpack.c.bf16 %v242_v6, %v241_v8 }
 0x134   :  { %v244_v12 = vmul.f32 1.050701, %v240_v10  ;;  %v239_v13 = vsel %vm227_vm6, %v205_v53, %v235_v9 }
 0x135   :  { %v243_v14 = vmul.f32 1.050701, %v239_v13  ;;  %496 = vmatpush3.bf16.msra.mxu1 %v495_v11 }
 0x136   :  { %497 = vmatprep.subr.bf16.mxu1 %v542_v36 }
 0x137   :  { %v498_v15 = vpack.c.bf16 %v244_v12, %v243_v14 }
 0x139   :  { %499 = vmatpush3.bf16.msra.mxu1 %v498_v15 }
 0x13c   :  { %444 = vmatmul.mubr.msk.f32.vlgmr.msra.gmra.mrb[0].mxu1 %vm256_vm7, %v245_v16 }
 0x20f   :  { %v326_v22 = vpop.f32.mrb[0].mxu1 }
 0x210   :  { %v327_v23 = vadd.f32 %v326_v22, %v255_v21  ;;  %v445_v24 = vpop.f32.mrb[1].mxu1 }
 0x212   :  { %v330_v25 = vmul.f32 1.442695, %v327_v23 }
 0x214   :  { %515 = vpow2.f32 %v330_v25 }
 0x21e   :  { %v516_v26 = vpop.eup %515 }
 0x21f   :  { %332 = vst [vmem:[#allocation3] sm:$0x1] %v516_v26 }
 0x220   :  { %528 = shalt.err (!%p525_p4)
}
 0x221   :  { %s529_s2 = scalar_lea.hbm %s713_s5, 16 }
 0x222   :  { %p530_p5 = scmp.ne.s32.totalorder %s713_s5, %s529_s2  ;;  %p533_p6 = scmp.lt.u32.totalorder %s529_s2, %s713_s5 }
 0x224   :  { %p535_p7 = pnand %p533_p6, %p530_p5 }
 0x226   :  { %538 = shalt.err (!%p535_p7)
}
 0x227   :  { %342 = dma.vmem_to_hbm [thread:$0]  %s340_s16, 16, %s713_s5, [#allocation4]  }
 0x228   :  { %539 = dma.done.wait [#allocation4], 16  }
 0x229   :  { %540 = vsyncadd [#allocation4], 4294967280 }
 0x22a   :  { %346 = vsyncpa [#allocation4], 1 }

</bundles_post_ra>
